<compile_context>
chip_gen: v7x
topology: tpu7x:2x2x1
jax: 0.10.0
libtpu: 0.0.40
codegen_flags: <defaults>
</compile_context>

<pallas_src>
import jax
import jax.numpy as jnp
from jax import lax
from jax.experimental import pallas as pl
from jax.experimental.pallas import tpu as pltpu


D_IN, D_H1, D_H2, D_OUT = 17, 128, 64, 1


def mlp_kernel(x_ref, w1_ref, b1_ref, w2_ref, b2_ref, w3_ref, b3_ref, o_ref):
    """Fused 3-layer MLP.  Natural-layout input tile, batch-on-lanes intermediates.

    x_ref  : (Bt, 17)   f32  -- natural row-major batch tile straight from HBM
    w1_ref : (128, 17)  bf16/f32 (PyTorch (out, in) layout)
    b1_ref : (128, 1)   f32
    w2_ref : (64, 128)  bf16/f32
    b2_ref : (64, 1)    f32
    w3_ref : (64, 1)    f32 (layer 3 runs on VPU + XLU, not MXU)
    b3_ref : (1, 1)     f32
    o_ref  : (1, Bt)    f32  -- lane-dense output slab
    """
    # In-kernel cast to the matmul dtype (no extra HBM pass over x in the wrapper).
    x = x_ref[...].astype(w1_ref.dtype)                     # (Bt, 17)

    # Layer 1: contract the size-17 axis of both operands -> (128, Bt), f32 MXU acc.
    h1 = lax.dot_general(
        w1_ref[...], x,
        dimension_numbers=(((1,), (1,)), ((), ())),
        preferred_element_type=jnp.float32)                 # (128, Bt)
    h1 = jnp.maximum(h1 + b1_ref[...], 0.0)                 # bias + ReLU in f32 (VPU)

    # Layer 2: (64, 128) @ (128, Bt) -> (64, Bt), bf16 MXU inputs / f32 accumulation.
    h2 = jnp.dot(w2_ref[...], h1.astype(w2_ref.dtype),
                 preferred_element_type=jnp.float32)        # (64, Bt)
    h2 = jnp.maximum(h2 + b2_ref[...], 0.0)

    # Layer 3 (out_features == 1): VPU multiply + cross-sublane (XLU) reduce;
    # keeps the 1-wide matmul off the MXU and overlaps with the next tile's dots.
    y = jnp.sum(h2 * w3_ref[...], axis=0, keepdims=True) + b3_ref[...]   # (1, Bt)
    o_ref[...] = y.astype(o_ref.dtype)


def _round_up(n, m):
    return ((n + m - 1) // m) * m


def _cdiv(a, b):
    return -(-a // b)


def _choose_batch_tile(B, block_b):
    """Pick (bt, Bp): lane-dense batch tile and padded batch length.

    - bt is a multiple of 128 (unmasked lane-dense output stores).
    - bt is capped at block_b (VMEM budget) and at ~1/4 of the padded batch so
      dimension_semantics=("parallel",) can spread tiles over v7x's 2 TensorCores.
    - When possible bt divides B exactly, so the wrapper never has to jnp.pad x
      (which would be an extra full HBM round trip over the only large tensor).
    """
    Bp0 = _round_up(B, 128)
    cap = max(128, min(block_b, _round_up(_cdiv(Bp0, 4), 128)))
    if B % 128 == 0:
        m = B // 128
        for d in range(min(cap // 128, m), 0, -1):
            if m % d == 0:
                bt = 128 * d
                # Accept if it is "big enough"; otherwise padding x once is cheaper
                # than many tiny grid steps.
                if bt * 8 >= cap or bt >= 4096:
                    return bt, B
                break
    return cap, _round_up(B, cap)


def neural_network1_forward(x, params, *, block_b=8192, use_bf16=True):
    """x: (B, 17) float32, params in PyTorch (out, in)/(out,) layout -> (B,) float32."""
    w1, b1, w2, b2, w3, b3 = params
    B = x.shape[0]

    # Sanitize the caller-supplied tile size: lane multiple, bounded for v7x VMEM.
    block_b = max(128, min(16384, _round_up(int(block_b), 128)))
    bt, Bp = _choose_batch_tile(B, block_b)

    compute_dtype = jnp.bfloat16 if use_bf16 else jnp.float32

    # Natural (B, 17) layout is fed straight to the kernel; pad only when the batch
    # is not tile-aligned (the bf16 cast of activations happens inside the kernel,
    # so x itself is never rewritten in HBM on the aligned path).
    xp = x if Bp == B else jnp.pad(x, ((0, Bp - B), (0, 0)))

    # Weights/biases are tiny: cast/reshape once here; they stay VMEM-resident.
    w1c = w1.astype(compute_dtype)                       # (128, 17)
    w2c = w2.astype(compute_dtype)                       # (64, 128)
    b1c = b1.reshape(D_H1, 1).astype(jnp.float32)
    b2c = b2.reshape(D_H2, 1).astype(jnp.float32)
    w3c = w3.reshape(D_H2, 1).astype(jnp.float32)        # column, f32
    b3c = b3.reshape(1, 1).astype(jnp.float32)

    def const(shape):
        return pl.BlockSpec(shape, lambda i: (0, 0))

    out = pl.pallas_call(
        mlp_kernel,
        out_shape=jax.ShapeDtypeStruct((1, Bp), jnp.float32),
        grid=(Bp // bt,),
        in_specs=[
            pl.BlockSpec((bt, D_IN), lambda i: (i, 0)),   # x row tile (double-buffered)
            const((D_H1, D_IN)),                          # w1 (VMEM-resident)
            const((D_H1, 1)),                             # b1
            const((D_H2, D_H1)),                          # w2
            const((D_H2, 1)),                             # b2
            const((D_H2, 1)),                             # w3 column
            const((1, 1)),                                # b3
        ],
        out_specs=pl.BlockSpec((1, bt), lambda i: (0, i)),
        compiler_params=pltpu.CompilerParams(
            dimension_semantics=("parallel",),        # shard batch tiles across TCs (v7x)
            vmem_limit_bytes=48 * 1024 * 1024,        # covers bt<=16384 f32 intermediates
        ),
    )(xp, w1c, b1c, w2c, b2c, w3c, b3c)

    # Lane-dense slab -> (B,)  (pure layout plumbing, no extra HBM pass).
    return out.reshape(-1)[:B]


def init_params(key):
    """PyTorch-default-style init, weights in (out_features, in_features) layout."""
    dims = [(D_IN, D_H1), (D_H1, D_H2), (D_H2, D_OUT)]
    params = []
    for fan_in, fan_out in dims:
        key, kw, kb = jax.random.split(key, 3)
        bound = 1.0 / jnp.sqrt(fan_in)
        w = jax.random.uniform(kw, (fan_out, fan_in), jnp.float32, -bound, bound)
        b = jax.random.uniform(kb, (fan_out,), jnp.float32, -bound, bound)
        params += [w, b]
    return tuple(params)


def reference_forward(x, params, *, use_bf16=True):
    w1, b1, w2, b2, w3, b3 = params
    dt = jnp.bfloat16 if use_bf16 else jnp.float32
    h1 = jnp.maximum(
        jnp.dot(x.astype(dt), w1.T.astype(dt), preferred_element_type=jnp.float32) + b1,
        0.0)
    h2 = jnp.maximum(
        jnp.dot(h1.astype(dt), w2.T.astype(dt), preferred_element_type=jnp.float32) + b2,
        0.0)
    y = jnp.dot(h2, w3.T) + b3
    return y[:, 0]


if __name__ == "__main__":
    key = jax.random.PRNGKey(0)
    key, kx = jax.random.split(key)

    # Small shapes consistent with the module: batch=8, features=17.
    B = 8
    x = jax.random.normal(kx, (B, D_IN), jnp.float32)
    params = init_params(key)

    # Default path: bf16 MXU inputs, f32 accumulation (single 128-lane tile, padded).
    out = jax.block_until_ready(neural_network1_forward(x, params))
    ref = reference_forward(x, params, use_bf16=True)
    assert out.shape == (B,)
    assert jnp.allclose(out, ref, atol=3e-3, rtol=3e-3)

    # f32 path (tight tolerance).
    out_f32 = jax.block_until_ready(neural_network1_forward(x, params, use_bf16=False))
    ref_f32 = reference_forward(x, params, use_bf16=False)
    assert jnp.allclose(out_f32, ref_f32, atol=1e-4, rtol=1e-4)

    # Multi-tile grid + padding fallback path (B=300 -> 3 tiles of 128).
    key, kx2 = jax.random.split(key)
    x2 = jax.random.normal(kx2, (300, D_IN), jnp.float32)
    out2 = jax.block_until_ready(neural_network1_forward(x2, params))
    ref2 = reference_forward(x2, params, use_bf16=True)
    assert out2.shape == (300,)
    assert jnp.allclose(out2, ref2, atol=3e-3, rtol=3e-3)

    # Aligned-batch path: no jnp.pad at all, >=4 tiles for v7x megacore (B=1024 -> 4x256).
    key, kx3 = jax.random.split(key)
    x3 = jax.random.normal(kx3, (1024, D_IN), jnp.float32)
    out3 = jax.block_until_ready(neural_network1_forward(x3, params))
    ref3 = reference_forward(x3, params, use_bf16=True)
    assert out3.shape == (1024,)
    assert jnp.allclose(out3, ref3, atol=3e-3, rtol=3e-3)

    print("KERNEL_OK")
</pallas_src>

<mosaic_0001>
module attributes {stable_mosaic.version = 11 : i64} {
  func.func @mlp_kernel(%arg0: i32, %arg1: memref<128x17xf32, #tpu.memory_space<vmem>>, %arg2: memref<128x17xbf16, #tpu.memory_space<vmem>>, %arg3: memref<128x1xf32, #tpu.memory_space<vmem>>, %arg4: memref<64x128xbf16, #tpu.memory_space<vmem>>, %arg5: memref<64x1xf32, #tpu.memory_space<vmem>>, %arg6: memref<64x1xf32, #tpu.memory_space<vmem>>, %arg7: memref<1x1xf32, #tpu.memory_space<vmem>>, %arg8: memref<1x128xf32, #tpu.memory_space<vmem>>) attributes {dimension_semantics = [#tpu.dimension_semantics<parallel>], iteration_bounds = array<i64: 1>, scalar_prefetch = 0 : i64, scratch_operands = 0 : i64, tpu.core_type = #tpu.core_type<tc>, window_params = [{transform_indices = @transform_0, window_bounds = array<i64: 128, 17>}, {pipeline_mode = #tpu.pipeline_mode<synchronous>, transform_indices = @transform_1, window_bounds = array<i64: 128, 17>}, {pipeline_mode = #tpu.pipeline_mode<synchronous>, transform_indices = @transform_2, window_bounds = array<i64: 128, 1>}, {pipeline_mode = #tpu.pipeline_mode<synchronous>, transform_indices = @transform_3, window_bounds = array<i64: 64, 128>}, {pipeline_mode = #tpu.pipeline_mode<synchronous>, transform_indices = @transform_4, window_bounds = array<i64: 64, 1>}, {pipeline_mode = #tpu.pipeline_mode<synchronous>, transform_indices = @transform_5, window_bounds = array<i64: 64, 1>}, {pipeline_mode = #tpu.pipeline_mode<synchronous>, transform_indices = @transform_6, window_bounds = array<i64: 1, 1>}, {transform_indices = @transform_7, window_bounds = array<i64: 1, 128>}]} {
    %c0 = arith.constant 0 : index
    %c0_0 = arith.constant 0 : index
    %0 = vector.load %arg1[%c0, %c0_0] : memref<128x17xf32, #tpu.memory_space<vmem>>, vector<128x17xf32>
    %1 = arith.truncf %0 : vector<128x17xf32> to vector<128x17xbf16>
    %c0_1 = arith.constant 0 : index
    %c0_2 = arith.constant 0 : index
    %2 = vector.load %arg2[%c0_1, %c0_2] : memref<128x17xbf16, #tpu.memory_space<vmem>>, vector<128x17xbf16>
    %cst = arith.constant dense<0.000000e+00> : vector<128x128xf32>
    %3 = tpu.matmul %2, %1, %cst {dimension_numbers = #tpu.dot_dimension_numbers<[1], [1], [0], [0], [0, 0, 1, 0], [], []>} : vector<128x17xbf16>, vector<128x17xbf16>, vector<128x128xf32> -> vector<128x128xf32>
    %c0_3 = arith.constant 0 : index
    %c0_4 = arith.constant 0 : index
    %4 = vector.load %arg3[%c0_3, %c0_4] : memref<128x1xf32, #tpu.memory_space<vmem>>, vector<128x1xf32>
    %5 = vector.broadcast %4 : vector<128x1xf32> to vector<128x128xf32>
    %6 = arith.addf %3, %5 : vector<128x128xf32>
    %cst_5 = arith.constant 0.000000e+00 : f32
    %7 = vector.broadcast %cst_5 : f32 to vector<128x128xf32>
    %8 = arith.maximumf %6, %7 : vector<128x128xf32>
    %c0_6 = arith.constant 0 : index
    %c0_7 = arith.constant 0 : index
    %9 = vector.load %arg4[%c0_6, %c0_7] : memref<64x128xbf16, #tpu.memory_space<vmem>>, vector<64x128xbf16>
    %10 = arith.truncf %8 : vector<128x128xf32> to vector<128x128xbf16>
    %cst_8 = arith.constant dense<0.000000e+00> : vector<64x128xf32>
    %11 = tpu.matmul %9, %10, %cst_8 {dimension_numbers = #tpu.dot_dimension_numbers<[1], [0], [0], [1], [0, 0, 1, 1], [], []>} : vector<64x128xbf16>, vector<128x128xbf16>, vector<64x128xf32> -> vector<64x128xf32>
    %c0_9 = arith.constant 0 : index
    %c0_10 = arith.constant 0 : index
    %12 = vector.load %arg5[%c0_9, %c0_10] : memref<64x1xf32, #tpu.memory_space<vmem>>, vector<64x1xf32>
    %13 = vector.broadcast %12 : vector<64x1xf32> to vector<64x128xf32>
    %14 = arith.addf %11, %13 : vector<64x128xf32>
    %cst_11 = arith.constant 0.000000e+00 : f32
    %15 = vector.broadcast %cst_11 : f32 to vector<64x128xf32>
    %16 = arith.maximumf %14, %15 : vector<64x128xf32>
    %c0_12 = arith.constant 0 : index
    %c0_13 = arith.constant 0 : index
    %17 = vector.load %arg6[%c0_12, %c0_13] : memref<64x1xf32, #tpu.memory_space<vmem>>, vector<64x1xf32>
    %18 = vector.broadcast %17 : vector<64x1xf32> to vector<64x128xf32>
    %19 = arith.mulf %16, %18 : vector<64x128xf32>
    %cst_14 = arith.constant dense<0.000000e+00> : vector<128xf32>
    %20 = vector.multi_reduction <add>, %19, %cst_14 [0] : vector<64x128xf32> to vector<128xf32>
    %21 = vector.shape_cast %20 : vector<128xf32> to vector<1x128xf32>
    %c0_15 = arith.constant 0 : index
    %c0_16 = arith.constant 0 : index
    %22 = vector.load %arg7[%c0_15, %c0_16] : memref<1x1xf32, #tpu.memory_space<vmem>>, vector<1x1xf32>
    %23 = vector.broadcast %22 : vector<1x1xf32> to vector<1x128xf32>
    %24 = arith.addf %21, %23 : vector<1x128xf32>
    %c0_17 = arith.constant 0 : index
    %c0_18 = arith.constant 0 : index
    %25 = vector.load %arg8[%c0_17, %c0_18] : memref<1x128xf32, #tpu.memory_space<vmem>>, vector<1x128xf32>
    tpu.vector_store %arg8[%c0_17, %c0_18], %24 {strides = array<i32>} : memref<1x128xf32, #tpu.memory_space<vmem>>, vector<1x128xf32>,
    return
  }
  func.func @transform_0(%arg0: i32) -> (i32, i32) {
    %c0_i32 = arith.constant 0 : i32
    %c0_i32_0 = arith.constant 0 : i32
    return %arg0, %c0_i32 : i32, i32
  }
  func.func @transform_1(%arg0: i32) -> (i32, i32) {
    %c0_i32 = arith.constant 0 : i32
    %c0_i32_0 = arith.constant 0 : i32
    %c0_i32_1 = arith.constant 0 : i32
    return %c0_i32, %c0_i32_0 : i32, i32
  }
  func.func @transform_2(%arg0: i32) -> (i32, i32) {
    %c0_i32 = arith.constant 0 : i32
    %c0_i32_0 = arith.constant 0 : i32
    %c0_i32_1 = arith.constant 0 : i32
    return %c0_i32, %c0_i32_0 : i32, i32
  }
  func.func @transform_3(%arg0: i32) -> (i32, i32) {
    %c0_i32 = arith.constant 0 : i32
    %c0_i32_0 = arith.constant 0 : i32
    %c0_i32_1 = arith.constant 0 : i32
    return %c0_i32, %c0_i32_0 : i32, i32
  }
  func.func @transform_4(%arg0: i32) -> (i32, i32) {
    %c0_i32 = arith.constant 0 : i32
    %c0_i32_0 = arith.constant 0 : i32
    %c0_i32_1 = arith.constant 0 : i32
    return %c0_i32, %c0_i32_0 : i32, i32
  }
  func.func @transform_5(%arg0: i32) -> (i32, i32) {
    %c0_i32 = arith.constant 0 : i32
    %c0_i32_0 = arith.constant 0 : i32
    %c0_i32_1 = arith.constant 0 : i32
    return %c0_i32, %c0_i32_0 : i32, i32
  }
  func.func @transform_6(%arg0: i32) -> (i32, i32) {
    %c0_i32 = arith.constant 0 : i32
    %c0_i32_0 = arith.constant 0 : i32
    %c0_i32_1 = arith.constant 0 : i32
    return %c0_i32, %c0_i32_0 : i32, i32
  }
  func.func @transform_7(%arg0: i32) -> (i32, i32) {
    %c0_i32 = arith.constant 0 : i32
    %c0_i32_0 = arith.constant 0 : i32
    return %c0_i32, %arg0 : i32, i32
  }
}

</mosaic_0001>

<bundles_post_ra>
// kernel: tpu_custom_call.1
= control target key start
LH: loop header
LB: loop body
LE: loop exit
PB: predicated region body
PF: predicated region fallthrough
CT: control target
= control target key end

     0   :  { %s1037_s0 = inlined_call_operand.vmem [shape: f32[128,17], index: 0, kind: input, shape index: {}]   ;;  %s1038_s1 = inlined_call_operand.vmem [shape: bf16[128,17], index: 1, kind: input, shape index: {}]   ;;  %s1039_s2 = inlined_call_operand.vmem [shape: f32[128,1], index: 2, kind: input, shape index: {}]   ;;  %s1040_s3 = inlined_call_operand.vmem [shape: bf16[64,128], index: 3, kind: input, shape index: {}]   ;;  %s1041_s4 = inlined_call_operand.vmem [shape: f32[64,1], index: 4, kind: input, shape index: {}]   ;;  %s1042_s5 = inlined_call_operand.vmem [shape: f32[64,1], index: 5, kind: input, shape index: {}]   ;;  %s1043_s6 = inlined_call_operand.<no memory space> [shape: f32[1,1], index: 6, kind: input, shape index: {}]   ;;  %s1044_s7 = inlined_call_operand.hbm [shape: f32[1,128], index: 7, kind: output, shape index: {}]  }
   0x1   :  { %v12_v0 = vstv %s1043_s6 }
   0x2   :  { %13 = vst [vmem:[#allocation2] sm:$0x1] %v12_v0 }
   0x3   :  { %v30_v1 = vld [vmem:[%s1037_s0] sm:$0xff]  ;;  %v31_v2 = vld [vmem:[%s1037_s0 + $0x8] sm:$0xff]  ;;  %vm206_vm0 = vcmask 138240   ;;  %v32_v3 = vld [vmem:[%s1037_s0 + $0x10] sm:$0xff]  ;;  %v776_v6 = vmov 0  }
   0x4   :  { %v46_v4 = vpack.c.bf16 %v31_v2, %v30_v1  ;;  %v33_v5 = vld [vmem:[%s1037_s0 + $0x18] sm:$0xff]  ;;  %738 = vset.pattern.permute.xlu0 %v776_v6  ;;  %739 = vset.pattern.permute.xlu1 %v776_v6  ;;  %v34_v9 = vld [vmem:[%s1037_s0 + $0x20] sm:$0xff]  ;;  %v35_v10 = vld [vmem:[%s1037_s0 + $0x28] sm:$0xff] }
   0x5   :  { %v47_v7 = vpack.c.bf16 %v33_v5, %v32_v3  ;;  %v740_v11 = vld [vmem:[%s1038_s1] sm:$0xff]   ;;  %v48_v13 = vpack.c.bf16 %v35_v10, %v34_v9  ;;  %v71_v15 = vld [vmem:[%s1039_s2 + $0x8] sm:$0xff]  ;;  %v36_v16 = vld [vmem:[%s1037_s0 + $0x30] sm:$0xff] }
   0x6   :  { %728 = vmatprep.subr.msk.bf16.mxu0 %vm206_vm0, %v46_v4  ;;  %v232_v8 = vsel %vm206_vm0, %v46_v4, 0  ;;  %688 = vmatprep.mubr.msk.bf16.mxu0 %vm206_vm0, %v740_v11  ;;  %v70_v14 = vld [vmem:[%s1039_s2] sm:$0xff]  ;;  %v37_v17 = vld [vmem:[%s1037_s0 + $0x38] sm:$0xff]  ;;  %v72_v18 = vld [vmem:[%s1039_s2 + $0x10] sm:$0xff] }
   0x7   :  { %673 = vmatpush3.bf16.xpose.msra.mxu0 %v232_v8  ;;  %v235_v12 = vsel %vm206_vm0, %v47_v7, 0  ;;  %88 = vperm.xlu0 %738, %v70_v14   ;;  %v73_v19 = vld [vmem:[%s1039_s2 + $0x18] sm:$0xff]  ;;  %v238_v20 = vsel %vm206_vm0, %v48_v13, 0  ;;  %v49_v21 = vpack.c.bf16 %v37_v17, %v36_v16  ;;  %v74_v22 = vld [vmem:[%s1039_s2 + $0x20] sm:$0xff]  ;;  %v75_v23 = vld [vmem:[%s1039_s2 + $0x28] sm:$0xff] }
   0x8   :  { %729 = vmatprep.subr.msk.bf16.mxu0 %vm206_vm0, %v47_v7  ;;  %98 = vperm.xlu1 %739, %v72_v18   ;;  %v76_v24 = vld [vmem:[%s1039_s2 + $0x30] sm:$0xff]  ;;  %v38_v25 = vld [vmem:[%s1037_s0 + $0x40] sm:$0xff]  ;;  %v39_v26 = vld [vmem:[%s1037_s0 + $0x48] sm:$0xff] }
   0x9   :  { %v78_v27 = vld [vmem:[%s1039_s2 + $0x40] sm:$0xff]  ;;  %v241_v28 = vsel %vm206_vm0, %v49_v21, 0  ;;  %v77_v29 = vld [vmem:[%s1039_s2 + $0x38] sm:$0xff]  ;;  %v50_v30 = vpack.c.bf16 %v39_v26, %v38_v25 }
   0xb   :  { %93 = vperm.xlu0 %738, %v71_v15  }
   0xc   :  { %103 = vperm.xlu1 %739, %v73_v19  }
   0xf   :  { %675 = vmatpush3.bf16.xpose.msra.mxu0 %v235_v12  ;;  %108 = vperm.xlu0 %738, %v74_v22  }
  0x10   :  { %730 = vmatprep.subr.msk.bf16.mxu0 %vm206_vm0, %v48_v13  ;;  %113 = vperm.xlu1 %739, %v75_v23  }
  0x13   :  { %118 = vperm.xlu0 %738, %v76_v24  }
  0x14   :  { %123 = vperm.xlu1 %739, %v77_v29  }
  0x17   :  { %677 = vmatpush3.bf16.xpose.msra.mxu0 %v238_v20 }
  0x18   :  { %731 = vmatprep.subr.msk.bf16.mxu0 %vm206_vm0, %v49_v21 }
  0x19   :  { %14 = vsyncpa [#allocation4], 0  ;;  %128 = vperm.xlu0 %738, %v78_v27   ;;  %v79_v31 = vld [vmem:[%s1039_s2 + $0x48] sm:$0xff]  ;;  %v80_v32 = vld [vmem:[%s1039_s2 + $0x50] sm:$0xff]  ;;  %v244_v36 = vsel %vm206_vm0, %v50_v30, 0 }
  0x1a   :  { %v40_v33 = vld [vmem:[%s1037_s0 + $0x50] sm:$0xff]  ;;  %v41_v34 = vld [vmem:[%s1037_s0 + $0x58] sm:$0xff]  ;;  %133 = vperm.xlu1 %739, %v79_v31   ;;  %v82_v38 = vld [vmem:[%s1039_s2 + $0x60] sm:$0xff] }
  0x1b   :  { %v81_v35 = vld [vmem:[%s1039_s2 + $0x58] sm:$0xff]  ;;  %v51_v37 = vpack.c.bf16 %v41_v34, %v40_v33  ;;  %v83_v39 = vld [vmem:[%s1039_s2 + $0x68] sm:$0xff]  ;;  %v84_v40 = vld [vmem:[%s1039_s2 + $0x70] sm:$0xff] }
  0x1c   :  { %v42_v41 = vld [vmem:[%s1037_s0 + $0x60] sm:$0xff]  ;;  %v43_v42 = vld [vmem:[%s1037_s0 + $0x68] sm:$0xff]  ;;  %v85_v43 = vld [vmem:[%s1039_s2 + $0x78] sm:$0xff] }
  0x1d   :  { %138 = vperm.xlu0 %738, %v80_v32   ;;  %v247_v44 = vsel %vm206_vm0, %v51_v37, 0  ;;  %v52_v45 = vpack.c.bf16 %v43_v42, %v42_v41  ;;  %v384_v46 = vld [vmem:[%s1041_s4] sm:$0xff]  ;;  %v385_v47 = vld [vmem:[%s1041_s4 + $0x8] sm:$0xff]  ;;  %v386_v48 = vld [vmem:[%s1041_s4 + $0x10] sm:$0xff] }
  0x1e   :  { %143 = vperm.xlu1 %739, %v81_v35   ;;  %v44_v49 = vld [vmem:[%s1037_s0 + $0x70] sm:$0xff]  ;;  %v45_v50 = vld [vmem:[%s1037_s0 + $0x78] sm:$0xff]  ;;  %v529_v54 = vld [vmem:[%s1042_s5] sm:$0xff] }
  0x1f   :  { %679 = vmatpush3.bf16.xpose.msra.mxu0 %v241_v28  ;;  %v387_v51 = vld [vmem:[%s1041_s4 + $0x18] sm:$0xff]  ;;  %v250_v52 = vsel %vm206_vm0, %v52_v45, 0  ;;  %v53_v53 = vpack.c.bf16 %v45_v50, %v44_v49  ;;  %v530_v55 = vld [vmem:[%s1042_s5 + $0x8] sm:$0xff]  ;;  %v388_v56 = vld [vmem:[%s1041_s4 + $0x20] sm:$0xff] }
  0x20   :  { %732 = vmatprep.subr.msk.bf16.mxu0 %vm206_vm0, %v50_v30  ;;  %v531_v57 = vld [vmem:[%s1042_s5 + $0x10] sm:$0xff]  ;;  %v389_v59 = vld [vmem:[%s1041_s4 + $0x28] sm:$0xff]  ;;  %v532_v60 = vld [vmem:[%s1042_s5 + $0x18] sm:$0xff] }
  0x21   :  { %148 = vperm.xlu0 %738, %v82_v38   ;;  %v253_v58 = vsel %vm206_vm0, %v53_v53, 0  ;;  %v390_v61 = vld [vmem:[%s1041_s4 + $0x30] sm:$0xff]  ;;  %v741_v62 = vld [vmem:[%s1038_s1 + $0x8] sm:$0xff]   ;;  %v533_v0 = vld [vmem:[%s1042_s5 + $0x20] sm:$0xff] }
  0x22   :  { %153 = vperm.xlu1 %739, %v83_v39   ;;  %v742_v63 = vld [vmem:[%s1038_s1 + $0x10] sm:$0xff]   ;;  %v391_v1 = vld [vmem:[%s1041_s4 + $0x38] sm:$0xff]  ;;  %v534_v2 = vld [vmem:[%s1042_s5 + $0x28] sm:$0xff] }
  0x23   :  { %v535_v3 = vld [vmem:[%s1042_s5 + $0x30] sm:$0xff]  ;;  %v743_v4 = vld [vmem:[%s1038_s1 + $0x18] sm:$0xff]   ;;  %v744_v5 = vld [vmem:[%s1038_s1 + $0x20] sm:$0xff]  }
  0x24   :  { %v536_v6 = vld [vmem:[%s1042_s5 + $0x38] sm:$0xff]  ;;  %v598_v7 = vld [vmem:[#allocation2] sm:$0x1]  ;;  %v745_v8 = vld [vmem:[%s1038_s1 + $0x28] sm:$0xff]  }
  0x25   :  { %158 = vperm.xlu0 %738, %v84_v40   ;;  %v746_v9 = vld [vmem:[%s1038_s1 + $0x30] sm:$0xff]   ;;  %v747_v10 = vld [vmem:[%s1038_s1 + $0x38] sm:$0xff]   ;;  %v748_v11 = vld [vmem:[%s1040_s3] sm:$0xff]  }
  0x26   :  { %163 = vperm.xlu1 %739, %v85_v43   ;;  %720 = vmatprep.mubr.bf16.mxu1 %v748_v11 }
  0x27   :  { %681 = vmatpush3.bf16.xpose.msra.mxu0 %v244_v36 }
  0x28   :  { %733 = vmatprep.subr.msk.bf16.mxu0 %vm206_vm0, %v51_v37 }
  0x29   :  { %394 = vperm.xlu0 %738, %v384_v46  }
  0x2a   :  { %399 = vperm.xlu1 %739, %v385_v47  }
  0x2d   :  { %404 = vperm.xlu0 %738, %v386_v48  }
  0x2e   :  { %409 = vperm.xlu1 %739, %v387_v51  }
  0x2f   :  { %683 = vmatpush3.bf16.xpose.msra.mxu0 %v247_v44 }
  0x30   :  { %734 = vmatprep.subr.msk.bf16.mxu0 %vm206_vm0, %v52_v45 }
  0x31   :  { %539 = vperm.xlu0 %738, %v529_v54  }
  0x32   :  { %544 = vperm.xlu1 %739, %v530_v55  }
  0x35   :  { %414 = vperm.xlu0 %738, %v388_v56  }
  0x36   :  { %549 = vperm.xlu1 %739, %v531_v57  }
  0x37   :  { %685 = vmatpush3.bf16.xpose.msra.mxu0 %v250_v52 }
  0x38   :  { %735 = vmatprep.subr.msk.bf16.mxu0 %vm206_vm0, %v53_v53 }
  0x39   :  { %419 = vperm.xlu0 %738, %v389_v59  }
  0x3a   :  { %554 = vperm.xlu1 %739, %v532_v60  }
  0x3d   :  { %424 = vperm.xlu0 %738, %v390_v61  }
  0x3e   :  { %559 = vperm.xlu1 %739, %v533_v0  }
  0x3f   :  { %687 = vmatpush3.bf16.xpose.msra.mxu0 %v253_v58 }
  0x41   :  { %429 = vperm.xlu0 %738, %v391_v1  }
  0x42   :  { %564 = vperm.xlu1 %739, %v534_v2  }
  0x45   :  { %569 = vperm.xlu0 %738, %v535_v3  }
  0x46   :  { %689 = vmatmul.mubr.msk.bf16.vlgmr.msra.gmra.mrb[0].mxu0 %vm206_vm0, %v741_v62  ;;  %574 = vperm.xlu1 %739, %v536_v6  }
  0x47   :  { %692 = vmatprep.mubr.msk.bf16.mxu0 %vm206_vm0, %v742_v63 }
  0x49   :  { %601 = vperm.xlu0 %738, %v598_v7  }
  0x4e   :  { %693 = vmatmul.mubr.msk.bf16.gmra.mrb[4].mxu0 %vm206_vm0, %v743_v4 }
  0x4f   :  { %696 = vmatprep.mubr.msk.bf16.mxu0 %vm206_vm0, %v744_v5 }
  0x56   :  { %697 = vmatmul.mubr.msk.bf16.gmra.mrb[8].mxu0 %vm206_vm0, %v745_v8 }
  0x57   :  { %700 = vmatprep.mubr.msk.bf16.mxu0 %vm206_vm0, %v746_v9 }
  0x5e   :  { %701 = vmatmul.mubr.msk.bf16.gmra.mrb[12].mxu0 %vm206_vm0, %v747_v10 }
  0x86   :  { %v89_v12 = vpop.permute.xlu0 %88 }
  0x87   :  { %v99_v13 = vpop.permute.xlu1 %98 }
  0x8a   :  { %v94_v14 = vpop.permute.xlu0 %93 }
  0x8b   :  { %v104_v15 = vpop.permute.xlu1 %103 }
  0x8e   :  { %v109_v16 = vpop.permute.xlu0 %108 }
  0x8f   :  { %v114_v17 = vpop.permute.xlu1 %113 }
  0x92   :  { %v119_v18 = vpop.permute.xlu0 %118 }
  0x93   :  { %v124_v22 = vpop.permute.xlu1 %123 }
  0x98   :  { %v129_v30 = vpop.permute.xlu0 %128 }
  0x99   :  { %v134_v34 = vpop.permute.xlu1 %133 }
  0x9c   :  { %v139_v43 = vpop.permute.xlu0 %138 }
  0x9d   :  { %v144_v47 = vpop.permute.xlu1 %143 }
  0xa0   :  { %v149_v55 = vpop.permute.xlu0 %148 }
  0xa1   :  { %v154_v60 = vpop.permute.xlu1 %153 }
  0xa4   :  { %v159_v3 = vpop.permute.xlu0 %158 }
  0xa5   :  { %v164_v8 = vpop.permute.xlu1 %163 }
 0x119   :  { %v690_v19 = vpop.f32.mrb[0].mxu0 }
 0x11a   :  { %v298_v20 = vadd.f32 %v690_v19, %v99_v13  ;;  %v289_v21 = vpop.f32.mrb[1].mxu0 }
 0x11b   :  { %v290_v23 = vadd.f32 %v289_v21, %v89_v12  ;;  %v691_v24 = vpop.f32.mrb[2].mxu0  ;;  %v750_v21 = vld [vmem:[%s1040_s3 + $0x10] sm:$0xff]  }
 0x11c   :  { %v301_v25 = vadd.f32 %v691_v24, %v104_v15  ;;  %v292_v26 = vpop.f32.mrb[3].mxu0  ;;  %v354_v28 = vmax.f32 %v298_v20, 0.0  ;;  %v749_v20 = vld [vmem:[%s1040_s3 + $0x8] sm:$0xff]   ;;  %v400_v24 = vpop.permute.xlu1 %399 }
 0x11d   :  { %v293_v27 = vadd.f32 %v292_v26, %v94_v14  ;;  %v352_v31 = vmax.f32 %v290_v23, 0.0  ;;  %v395_v23 = vpop.permute.xlu0 %394 }
 0x11e   :  { %v355_v29 = vmax.f32 %v301_v25, 0.0 }
 0x11f   :  { %v353_v32 = vmax.f32 %v293_v27, 0.0 }
 0x120   :  { %v377_v33 = vpack.c.bf16 %v355_v29, %v354_v28  ;;  %v410_v26 = vpop.permute.xlu1 %409 }
 0x121   :  { %v694_v35 = vpop.f32.mrb[4].mxu0  ;;  %v376_v36 = vpack.c.bf16 %v353_v32, %v352_v31  ;;  %v405_v25 = vpop.permute.xlu0 %404 }
 0x122   :  { %v314_v37 = vadd.f32 %v694_v35, %v119_v18  ;;  %v305_v38 = vpop.f32.mrb[5].mxu0 }
 0x123   :  { %v306_v39 = vadd.f32 %v305_v38, %v109_v16  ;;  %v695_v40 = vpop.f32.mrb[6].mxu0  ;;  %704 = vmatprep.subr.bf16.mxu1 %v376_v36 }
 0x124   :  { %v317_v41 = vadd.f32 %v695_v40, %v124_v22  ;;  %v308_v42 = vpop.f32.mrb[7].mxu0  ;;  %705 = vmatpush3.bf16.msra.mxu1 %v376_v36  ;;  %v358_v45 = vmax.f32 %v314_v37, 0.0  ;;  %v751_v22 = vld [vmem:[%s1040_s3 + $0x18] sm:$0xff]   ;;  %v545_v28 = vpop.permute.xlu1 %544  ;;  %s777_s3 = smov [#allocation3]  }
 0x125   :  { %v309_v44 = vadd.f32 %v308_v42, %v114_v17  ;;  %706 = vmatprep.subr.bf16.mxu1 %v377_v33  ;;  %v356_v48 = vmax.f32 %v306_v39, 0.0  ;;  %v540_v27 = vpop.permute.xlu0 %539  ;;  %s616_s19 = sshll.u32 %s777_s3, 4  ;;  %s617_s19 = int_to_ptr.vmem [resolvable:$true] %s616_s19 }
 0x126   :  { %v359_v46 = vmax.f32 %v317_v41, 0.0  ;;  %s752_s20 = scalar_lea.vmem %s617_s19, 16  ;;  %s756_s21 = scalar_lea.vmem %s617_s19, 32 }
 0x127   :  { %v357_v49 = vmax.f32 %v309_v44, 0.0  ;;  %p753_p0 = scmp.ne.s32.totalorder %s617_s19, %s752_s20  ;;  %p757_p1 = scmp.lt.s32.totalorder %s617_s19, %s617_s19 }
 0x128   :  { %v379_v50 = vpack.c.bf16 %v359_v46, %v358_v45  ;;  %707 = vmatpush3.bf16.msra.mxu1 %v377_v33  ;;  %p758_p2 = scmp.lt.s32.totalorder %s756_s21, %s752_s20 }
 0x129   :  { %v378_v51 = vpack.c.bf16 %v357_v49, %v356_v48  ;;  %v698_v52 = vpop.f32.mrb[8].mxu0  ;;  %v415_v29 = vpop.permute.xlu0 %414 }
 0x12a   :  { %v330_v53 = vadd.f32 %v698_v52, %v139_v43  ;;  %v321_v54 = vpop.f32.mrb[9].mxu0  ;;  %p759_p3 = por %p758_p2, %p757_p1 }
 0x12b   :  { %v322_v56 = vadd.f32 %v321_v54, %v129_v30  ;;  %v699_v57 = vpop.f32.mrb[10].mxu0  ;;  %708 = vmatprep.subr.bf16.mxu1 %v378_v51  ;;  %v550_v30 = vpop.permute.xlu1 %549 }
 0x12c   :  { %v333_v58 = vadd.f32 %v699_v57, %v144_v47  ;;  %v324_v59 = vpop.f32.mrb[11].mxu0  ;;  %709 = vmatpush3.bf16.msra.mxu1 %v378_v51  ;;  %v362_v62 = vmax.f32 %v330_v53, 0.0  ;;  %p760_p4 = pnand %p759_p3, %p753_p0 }
 0x12d   :  { %v325_v61 = vadd.f32 %v324_v59, %v134_v34  ;;  %710 = vmatprep.subr.bf16.mxu1 %v379_v50  ;;  %v360_v0 = vmax.f32 %v322_v56, 0.0  ;;  %v420_v31 = vpop.permute.xlu0 %419 }
 0x12e   :  { %v363_v63 = vmax.f32 %v333_v58, 0.0 }
 0x12f   :  { %v361_v1 = vmax.f32 %v325_v61, 0.0  ;;  %v555_v33 = vpop.permute.xlu1 %554 }
 0x130   :  { %v381_v2 = vpack.c.bf16 %v363_v63, %v362_v62  ;;  %711 = vmatpush3.bf16.msra.mxu1 %v379_v50 }
 0x131   :  { %v380_v4 = vpack.c.bf16 %v361_v1, %v360_v0  ;;  %v702_v5 = vpop.f32.mrb[12].mxu0  ;;  %v425_v42 = vpop.permute.xlu0 %424 }
 0x132   :  { %v346_v6 = vadd.f32 %v702_v5, %v159_v3  ;;  %v337_v7 = vpop.f32.mrb[13].mxu0 }
 0x133   :  { %v338_v9 = vadd.f32 %v337_v7, %v149_v55  ;;  %v703_v10 = vpop.f32.mrb[14].mxu0  ;;  %712 = vmatprep.subr.bf16.mxu1 %v380_v4  ;;  %v560_v45 = vpop.permute.xlu1 %559 }
 0x134   :  { %v349_v11 = vadd.f32 %v703_v10, %v164_v8  ;;  %v340_v12 = vpop.f32.mrb[15].mxu0  ;;  %713 = vmatpush3.bf16.msra.mxu1 %v380_v4  ;;  %v366_v14 = vmax.f32 %v346_v6, 0.0 }
 0x135   :  { %v341_v13 = vadd.f32 %v340_v12, %v154_v60  ;;  %714 = vmatprep.subr.bf16.mxu1 %v381_v2  ;;  %v364_v16 = vmax.f32 %v338_v9, 0.0  ;;  %v430_v56 = vpop.permute.xlu0 %429 }
 0x136   :  { %v367_v15 = vmax.f32 %v349_v11, 0.0 }
 0x137   :  { %v365_v17 = vmax.f32 %v341_v13, 0.0  ;;  %v565_v63 = vpop.permute.xlu1 %564  ;;  %v604_v13 = vlaneseq }
 0x138   :  { %v383_v18 = vpack.c.bf16 %v367_v15, %v366_v14  ;;  %715 = vmatpush3.bf16.msra.mxu1 %v381_v2 }
 0x139   :  { %v382_v19 = vpack.c.bf16 %v365_v17, %v364_v16  ;;  %v570_v7 = vpop.permute.xlu0 %569  ;;  %v605_v16 = vshrl.u32 %v604_v13, 7 }
 0x13b   :  { %716 = vmatprep.subr.bf16.mxu1 %v382_v19  ;;  %v575_v10 = vpop.permute.xlu1 %574 }
 0x13c   :  { %717 = vmatpush3.bf16.msra.mxu1 %v382_v19  ;;  %v606_v19 = vsub.s32 0, %v605_v16 }
 0x13d   :  { %718 = vmatprep.subr.bf16.mxu1 %v383_v18 }
 0x140   :  { %719 = vmatpush3.bf16.msra.mxu1 %v383_v18 }
 0x143   :  { %721 = vmatmul.mubr.bf16.vlgmr.msra.gmra.mrb[0].mxu1 %v749_v20 }
 0x144   :  { %724 = vmatprep.mubr.bf16.mxu1 %v750_v21  ;;  %v602_v21 = vpop.permute.xlu0 %601 }
 0x14b   :  { %725 = vmatmul.mubr.bf16.gmra.mrb[4].mxu1 %v751_v22 }
 0x216   :  { %v722_v32 = vpop.f32.mrb[0].mxu1 }
 0x217   :  { %v490_v34 = vpop.f32.mrb[1].mxu1  ;;  %v499_v35 = vadd.f32 %v722_v32, %v405_v25 }
 0x218   :  { %v491_v36 = vadd.f32 %v490_v34, %v395_v23  ;;  %v723_v37 = vpop.f32.mrb[2].mxu1  ;;  %v607_v23 = vrot.slane %v602_v21, %v606_v19 }
 0x219   :  { %v502_v38 = vadd.f32 %v723_v37, %v410_v26  ;;  %v493_v39 = vpop.f32.mrb[3].mxu1  ;;  %v523_v43 = vmax.f32 %v499_v35, 0.0 }
 0x21a   :  { %v521_v40 = vmax.f32 %v491_v36, 0.0  ;;  %v494_v41 = vadd.f32 %v493_v39, %v400_v24 }
 0x21b   :  { %v524_v46 = vmax.f32 %v502_v38, 0.0  ;;  %v579_v51 = vmul.f32 %v550_v30, %v523_v43 }
 0x21c   :  { %v522_v44 = vmax.f32 %v494_v41, 0.0  ;;  %v577_v47 = vmul.f32 %v540_v27, %v521_v40 }
 0x21d   :  { %v580_v57 = vmul.f32 %v555_v33, %v524_v46 }
 0x21e   :  { %v578_v48 = vmul.f32 %v545_v28, %v522_v44  ;;  %v726_v49 = vpop.f32.mrb[4].mxu1 }
 0x21f   :  { %v506_v50 = vpop.f32.mrb[5].mxu1  ;;  %v515_v53 = vadd.f32 %v726_v49, %v425_v42 }
 0x220   :  { %v585_v52 = vadd.f32 %v578_v48, %v577_v47  ;;  %v507_v54 = vadd.f32 %v506_v50, %v415_v29  ;;  %v727_v55 = vpop.f32.mrb[6].mxu1 }
 0x221   :  { %v509_v58 = vpop.f32.mrb[7].mxu1  ;;  %v518_v61 = vadd.f32 %v727_v55, %v430_v56  ;;  %v527_v0 = vmax.f32 %v515_v53, 0.0 }
 0x222   :  { %v586_v59 = vadd.f32 %v585_v52, %v579_v51  ;;  %v525_v60 = vmax.f32 %v507_v54, 0.0  ;;  %v510_v62 = vadd.f32 %v509_v58, %v420_v31 }
 0x223   :  { %v528_v5 = vmax.f32 %v518_v61, 0.0  ;;  %v583_v8 = vmul.f32 %v570_v7, %v527_v0 }
 0x224   :  { %v581_v1 = vmul.f32 %v560_v45, %v525_v60  ;;  %v587_v2 = vadd.f32 %v586_v59, %v580_v57  ;;  %v526_v3 = vmax.f32 %v510_v62, 0.0 }
 0x225   :  { %v584_v11 = vmul.f32 %v575_v10, %v528_v5 }
 0x226   :  { %v588_v4 = vadd.f32 %v587_v2, %v581_v1  ;;  %v582_v6 = vmul.f32 %v565_v63, %v526_v3 }
 0x228   :  { %v589_v9 = vadd.f32 %v588_v4, %v582_v6 }
 0x22a   :  { %v590_v12 = vadd.f32 %v589_v9, %v583_v8 }
 0x22c   :  { %v591_v14 = vadd.f32 %v590_v12, %v584_v11 }
 0x22e   :  { %v592_v15 = vrot.slane %v591_v14, 4 }
 0x230   :  { %v593_v17 = vadd.f32 %v592_v15, %v591_v14 }
 0x232   :  { %v594_v18 = vrot.slane %v593_v17, 2 }
 0x234   :  { %v595_v20 = vadd.f32 %v594_v18, %v593_v17 }
 0x236   :  { %v596_v22 = vrot.slane %v595_v20, 1 }
 0x238   :  { %v597_v24 = vadd.f32 %v596_v22, %v595_v20 }
 0x23a   :  { %v608_v25 = vadd.f32 %v607_v23, %v597_v24 }
 0x23c   :  { %609 = vst [vmem:[#allocation3] sm:$0x1] %v608_v25 }
 0x23d   :  { %763 = shalt.err (!%p760_p4)
}
 0x23e   :  { %s764_s23 = scalar_lea.hbm %s1044_s7, 16 }
 0x23f   :  { %p765_p5 = scmp.ne.s32.totalorder %s1044_s7, %s764_s23  ;;  %p768_p6 = scmp.lt.u32.totalorder %s764_s23, %s1044_s7 }
 0x241   :  { %p770_p7 = pnand %p768_p6, %p765_p5 }
 0x243   :  { %773 = shalt.err (!%p770_p7)
}
 0x244   :  { %619 = dma.vmem_to_hbm [thread:$0]  %s617_s19, 16, %s1044_s7, [#allocation4]  }
 0x245   :  { %774 = dma.done.wait [#allocation4], 16  }
 0x246   :  { %775 = vsyncadd [#allocation4], 4294967280 }
 0x247   :  { %623 = vsyncpa [#allocation4], 1 }

</bundles_post_ra>
